<compile_context>
chip_gen: v6e
topology: v6e:2x2x1
jax: 0.10.0
libtpu: 0.0.40
codegen_flags: <defaults>
</compile_context>

<pallas_src>
import functools

import jax
import jax.numpy as jnp
from jax.experimental import pallas as pl
from jax.experimental.pallas import tpu as pltpu

LANE = 128
BN_EPS = 1e-5


def _round_up(n, m=LANE):
    return ((n + m - 1) // m) * m


# ----------------------------------------------------------------------------
# Single fused Pallas kernel: (Linear -> BN -> ReLU)^n -> Linear
# ----------------------------------------------------------------------------
def _fused_dnn_kernel(*refs, n_hidden):
    """Ref layout (all full-array VMEM blocks):
         refs[0] : x       [B, input_dim]                 (f32, unpadded)
         refs[1] : W0      [input_dim, Dp]                (N padded to Dp)
         refs[2] : Ws      [n_hidden-1, Dp, Dp]           (only if n_hidden > 1)
         then    : gb      [2*n_hidden, Dp]               (rows 2i=gamma_i, 2i+1=beta_i)
                   W_out   [Dp, output_dim]               (K padded, N true width)
                   b_out   [1, output_dim]
                   o       [B, output_dim]
    Zero padding is exact: padded columns stay identically zero through
    Linear -> BN -> ReLU, and padded W_out rows multiply zero activations.
    """
    x_ref = refs[0]
    w0_ref = refs[1]
    has_stack = n_hidden > 1
    ws_ref = refs[2] if has_stack else None
    base = 3 if has_stack else 2
    gb_ref, w_out_ref, b_out_ref, o_ref = (
        refs[base], refs[base + 1], refs[base + 2], refs[base + 3])

    h = x_ref[...]                       # [B, input_dim] f32, resident end-to-end
    inv_b = 1.0 / h.shape[0]             # static batch size
    gb = gb_ref[...]                     # tiny [2*n_hidden, Dp] slab, load once

    for i in range(n_hidden):
        w = w0_ref[...] if i == 0 else ws_ref[i - 1]

        # Hidden-layer Linear bias intentionally omitted: BN's mean subtraction
        # cancels it exactly (dead compute).
        y = jnp.dot(h, w, preferred_element_type=jnp.float32)        # MXU

        # Single-pass BatchNorm1d batch stats (biased var, PyTorch train mode),
        # folded into a per-column scale/shift so the [B, Dp] tensor only sees
        # one mul + one add.
        s = jnp.sum(y, axis=0, keepdims=True)                        # [1, Dp]
        ss = jnp.sum(y * y, axis=0, keepdims=True)                   # [1, Dp]
        mean = s * inv_b
        var = jnp.maximum(ss * inv_b - mean * mean, 0.0)
        scale = gb[2 * i] * jax.lax.rsqrt(var + BN_EPS)              # [1, Dp]
        shift = gb[2 * i + 1] - mean * scale                         # [1, Dp]

        h = jnp.maximum(y * scale + shift, 0.0)                      # BN + ReLU

    o_ref[...] = (jnp.dot(h, w_out_ref[...], preferred_element_type=jnp.float32)
                  + b_out_ref[...])


# ----------------------------------------------------------------------------
# Parameter construction (PyTorch-shaped) + packed/padded kernel operands
# ----------------------------------------------------------------------------
def init_dnn_params(key, input_dim, hidden_dim_list):
    """PyTorch-default-like init, unpadded shapes (used by the reference).

    hidden_dim_list[:-1] -> hidden layers (Linear + BN + ReLU)
    hidden_dim_list[-1]  -> output Linear
    """
    hidden_dims = [int(d) for d in hidden_dim_list[:-1]]
    output_dim = int(hidden_dim_list[-1])

    params = {"hidden": [], "out": None}
    d_in = input_dim
    for d_out in hidden_dims:
        key, kw, kb = jax.random.split(key, 3)
        bound = 1.0 / (d_in ** 0.5)                       # nn.Linear default range
        w = jax.random.uniform(kw, (d_in, d_out), jnp.float32, -bound, bound)
        b = jax.random.uniform(kb, (1, d_out), jnp.float32, -bound, bound)
        gamma = jnp.ones((1, d_out), jnp.float32)         # BN weight
        beta = jnp.zeros((1, d_out), jnp.float32)         # BN bias
        params["hidden"].append((w, b, gamma, beta))
        d_in = d_out

    key, kw, kb = jax.random.split(key, 3)
    bound = 1.0 / (d_in ** 0.5)
    w = jax.random.uniform(kw, (d_in, output_dim), jnp.float32, -bound, bound)
    b = jax.random.uniform(kb, (1, output_dim), jnp.float32, -bound, bound)
    params["out"] = (w, b)
    return params


def pack_params_for_kernel(params):
    """Pack + lane-pad parameters for the fused kernel.

    * All hidden widths are padded to a common Dp (multiple of 128) so the
      hidden Ws (layers >= 1) stack into one [n-1, Dp, Dp] slab (one DMA).
    * gamma/beta rows are packed into one [2*n, Dp] slab (one DMA).
    * W0 keeps its true K (= input_dim) so x needs no wrapper-side padding.
    * W_out keeps its true N (= output_dim) so the output needs no slicing.
    * Hidden Linear biases are dropped (cancelled exactly by train-mode BN).
    """
    hidden = params["hidden"]
    n_hidden = len(hidden)
    assert n_hidden >= 1, "TODO(synk): n_hidden == 0 (single Linear) not packed here"

    dpm = max(_round_up(w.shape[1]) for (w, _b, _g, _bt) in hidden)

    def pad2(a, r, c):
        return jnp.pad(a, ((0, r - a.shape[0]), (0, c - a.shape[1])))

    # First hidden layer: true K, padded N.
    w0, _b0, g0, bt0 = hidden[0]
    w0_p = pad2(w0, w0.shape[0], dpm)

    # Remaining hidden layers stacked into one slab.
    ws = None
    if n_hidden > 1:
        ws = jnp.stack([pad2(w, dpm, dpm) for (w, _b, _g, _bt) in hidden[1:]])

    # gamma/beta slab: rows 2i = gamma_i, 2i+1 = beta_i.
    gb_rows = []
    for (_w, _b, g, bt) in hidden:
        gb_rows.append(pad2(g, 1, dpm))
        gb_rows.append(pad2(bt, 1, dpm))
    gb = jnp.concatenate(gb_rows, axis=0)                 # [2*n_hidden, dpm]

    # Output Linear: K padded to dpm (extra rows are zero and multiply the
    # zero-valued padded activation columns), N kept at true output width.
    w_out, b_out = params["out"]
    w_out_p = pad2(w_out, dpm, w_out.shape[1])

    return {"w0": w0_p, "ws": ws, "gb": gb, "w_out": w_out_p, "b_out": b_out}


# ----------------------------------------------------------------------------
# Forward pass: exactly one pallas_call (no wrapper pad / slice ops)
# ----------------------------------------------------------------------------
@jax.jit
def dnn_forward(packed, x):
    w0, ws, gb = packed["w0"], packed["ws"], packed["gb"]
    w_out, b_out = packed["w_out"], packed["b_out"]

    n_hidden = gb.shape[0] // 2
    B = x.shape[0]
    out_dim = w_out.shape[1]
    dpm = w0.shape[1]

    flat = [x, w0]
    if ws is not None:
        flat.append(ws)
    flat += [gb, w_out, b_out]

    # Derived VMEM budget (everything is resident; no grid double-buffering).
    out_bytes = B * out_dim * 4
    operand_bytes = sum(int(a.size) * a.dtype.itemsize for a in flat)
    footprint = operand_bytes + out_bytes
    vmem_limit = int(min(100 * 1024 * 1024,
                         max(8 * 1024 * 1024, 2 * footprint + (4 << 20))))

    # Advisory cost estimate for XLA's scheduler.
    flops = 2 * B * x.shape[1] * w0.shape[1]
    if ws is not None:
        flops += 2 * B * int(ws.shape[0]) * int(ws.shape[1]) * int(ws.shape[2])
    flops += 2 * B * w_out.shape[0] * w_out.shape[1]
    cost = pl.CostEstimate(flops=int(flops),
                           transcendentals=int(n_hidden * dpm),
                           bytes_accessed=int(footprint))

    vmem = pl.BlockSpec(memory_space=pltpu.MemorySpace.VMEM)
    return pl.pallas_call(
        functools.partial(_fused_dnn_kernel, n_hidden=n_hidden),
        out_shape=jax.ShapeDtypeStruct((B, out_dim), jnp.float32),
        in_specs=[vmem] * len(flat),
        out_specs=vmem,
        compiler_params=pltpu.CompilerParams(vmem_limit_bytes=vmem_limit),
        cost_estimate=cost,
    )(*flat)


# ----------------------------------------------------------------------------
# Pure-JAX reference (exact PyTorch semantics, incl. hidden biases and
# two-pass BN statistics) for a numerical sanity check.
# ----------------------------------------------------------------------------
def dnn_forward_ref(params, x):
    h = x
    for (w, b, gamma, beta) in params["hidden"]:
        y = h @ w + b
        mean = jnp.mean(y, axis=0, keepdims=True)
        var = jnp.mean((y - mean) ** 2, axis=0, keepdims=True)
        y = (y - mean) / jnp.sqrt(var + BN_EPS) * gamma + beta
        h = jnp.maximum(y, 0.0)
    w, b = params["out"]
    return h @ w + b


if __name__ == "__main__":
    # Small shapes consistent with the module:
    #   input_dim=32, hidden_dim_list=[64, 48, 16] -> hidden layers [64, 48], output 16
    B = 8                      # multiple of 8 (f32 sublanes)
    input_dim = 32
    hidden_dim_list = [64, 48, 16]

    key = jax.random.PRNGKey(0)
    key, kx = jax.random.split(key)
    x = jax.random.normal(kx, (B, input_dim), jnp.float32)

    params = init_dnn_params(key, input_dim, hidden_dim_list)
    packed = pack_params_for_kernel(params)

    out = dnn_forward(packed, x)
    out = jax.block_until_ready(out)

    ref = dnn_forward_ref(params, x)
    assert out.shape == (B, hidden_dim_list[-1])
    assert jnp.allclose(out, ref, atol=1e-3, rtol=1e-3), "mismatch vs JAX reference"

    print("KERNEL_OK")
</pallas_src>

<mosaic_0001>
module attributes {stable_mosaic.version = 11 : i64} {
  func.func @_fused_dnn_kernel(%arg0: memref<8x32xf32, #tpu.memory_space<vmem>>, %arg1: memref<32x128xf32, #tpu.memory_space<vmem>>, %arg2: memref<1x128x128xf32, #tpu.memory_space<vmem>>, %arg3: memref<4x128xf32, #tpu.memory_space<vmem>>, %arg4: memref<128x16xf32, #tpu.memory_space<vmem>>, %arg5: memref<1x16xf32, #tpu.memory_space<vmem>>, %arg6: memref<8x16xf32, #tpu.memory_space<vmem>>) attributes {dimension_semantics = [], scalar_prefetch = 0 : i64, scratch_operands = 0 : i64, tpu.core_type = #tpu.core_type<tc>} {
    %c0 = arith.constant 0 : index
    %c0_0 = arith.constant 0 : index
    %0 = vector.load %arg0[%c0, %c0_0] : memref<8x32xf32, #tpu.memory_space<vmem>>, vector<8x32xf32>
    %c0_1 = arith.constant 0 : index
    %c0_2 = arith.constant 0 : index
    %1 = vector.load %arg3[%c0_1, %c0_2] : memref<4x128xf32, #tpu.memory_space<vmem>>, vector<4x128xf32>
    %c0_3 = arith.constant 0 : index
    %c0_4 = arith.constant 0 : index
    %2 = vector.load %arg1[%c0_3, %c0_4] : memref<32x128xf32, #tpu.memory_space<vmem>>, vector<32x128xf32>
    %cst = arith.constant dense<0.000000e+00> : vector<8x128xf32>
    %3 = tpu.matmul %0, %2, %cst {dimension_numbers = #tpu.dot_dimension_numbers<[1], [0], [0], [1], [0, 0, 1, 1], [], []>} : vector<8x32xf32>, vector<32x128xf32>, vector<8x128xf32> -> vector<8x128xf32>
    %cst_5 = arith.constant dense<0.000000e+00> : vector<128xf32>
    %4 = vector.multi_reduction <add>, %3, %cst_5 [0] : vector<8x128xf32> to vector<128xf32>
    %5 = vector.shape_cast %4 : vector<128xf32> to vector<1x128xf32>
    %6 = arith.mulf %3, %3 : vector<8x128xf32>
    %cst_6 = arith.constant dense<0.000000e+00> : vector<128xf32>
    %7 = vector.multi_reduction <add>, %6, %cst_6 [0] : vector<8x128xf32> to vector<128xf32>
    %8 = vector.shape_cast %7 : vector<128xf32> to vector<1x128xf32>
    %cst_7 = arith.constant 1.250000e-01 : f32
    %9 = vector.broadcast %cst_7 : f32 to vector<1x128xf32>
    %10 = arith.mulf %5, %9 : vector<1x128xf32>
    %cst_8 = arith.constant 1.250000e-01 : f32
    %11 = vector.broadcast %cst_8 : f32 to vector<1x128xf32>
    %12 = arith.mulf %8, %11 : vector<1x128xf32>
    %13 = arith.mulf %10, %10 : vector<1x128xf32>
    %14 = arith.subf %12, %13 : vector<1x128xf32>
    %cst_9 = arith.constant 0.000000e+00 : f32
    %15 = vector.broadcast %cst_9 : f32 to vector<1x128xf32>
    %16 = arith.maximumf %14, %15 : vector<1x128xf32>
    %17 = vector.extract_strided_slice %1 {offsets = [0, 0], sizes = [1, 128], strides = [1, 1]} : vector<4x128xf32> to vector<1x128xf32>
    %18 = vector.shape_cast %17 : vector<1x128xf32> to vector<128xf32>
    %cst_10 = arith.constant 9.99999974E-6 : f32
    %19 = vector.broadcast %cst_10 : f32 to vector<1x128xf32>
    %20 = arith.addf %16, %19 : vector<1x128xf32>
    %21 = math.rsqrt %20 : vector<1x128xf32>
    %22 = vector.shape_cast %18 : vector<128xf32> to vector<1x128xf32>
    %23 = arith.mulf %22, %21 : vector<1x128xf32>
    %24 = vector.extract_strided_slice %1 {offsets = [1, 0], sizes = [1, 128], strides = [1, 1]} : vector<4x128xf32> to vector<1x128xf32>
    %25 = vector.shape_cast %24 : vector<1x128xf32> to vector<128xf32>
    %26 = arith.mulf %10, %23 : vector<1x128xf32>
    %27 = vector.shape_cast %25 : vector<128xf32> to vector<1x128xf32>
    %28 = arith.subf %27, %26 : vector<1x128xf32>
    %29 = vector.broadcast %23 : vector<1x128xf32> to vector<8x128xf32>
    %30 = arith.mulf %3, %29 : vector<8x128xf32>
    %31 = vector.broadcast %28 : vector<1x128xf32> to vector<8x128xf32>
    %32 = arith.addf %30, %31 : vector<8x128xf32>
    %cst_11 = arith.constant 0.000000e+00 : f32
    %33 = vector.broadcast %cst_11 : f32 to vector<8x128xf32>
    %34 = arith.maximumf %32, %33 : vector<8x128xf32>
    %c0_12 = arith.constant 0 : index
    %c0_13 = arith.constant 0 : index
    %c0_14 = arith.constant 0 : index
    %35 = vector.load %arg2[%c0_12, %c0_13, %c0_14] : memref<1x128x128xf32, #tpu.memory_space<vmem>>, vector<1x128x128xf32>
    %36 = vector.shape_cast %35 : vector<1x128x128xf32> to vector<128x128xf32>
    %cst_15 = arith.constant dense<0.000000e+00> : vector<8x128xf32>
    %37 = tpu.matmul %34, %36, %cst_15 {dimension_numbers = #tpu.dot_dimension_numbers<[1], [0], [0], [1], [0, 0, 1, 1], [], []>} : vector<8x128xf32>, vector<128x128xf32>, vector<8x128xf32> -> vector<8x128xf32>
    %cst_16 = arith.constant dense<0.000000e+00> : vector<128xf32>
    %38 = vector.multi_reduction <add>, %37, %cst_16 [0] : vector<8x128xf32> to vector<128xf32>
    %39 = vector.shape_cast %38 : vector<128xf32> to vector<1x128xf32>
    %40 = arith.mulf %37, %37 : vector<8x128xf32>
    %cst_17 = arith.constant dense<0.000000e+00> : vector<128xf32>
    %41 = vector.multi_reduction <add>, %40, %cst_17 [0] : vector<8x128xf32> to vector<128xf32>
    %42 = vector.shape_cast %41 : vector<128xf32> to vector<1x128xf32>
    %cst_18 = arith.constant 1.250000e-01 : f32
    %43 = vector.broadcast %cst_18 : f32 to vector<1x128xf32>
    %44 = arith.mulf %39, %43 : vector<1x128xf32>
    %cst_19 = arith.constant 1.250000e-01 : f32
    %45 = vector.broadcast %cst_19 : f32 to vector<1x128xf32>
    %46 = arith.mulf %42, %45 : vector<1x128xf32>
    %47 = arith.mulf %44, %44 : vector<1x128xf32>
    %48 = arith.subf %46, %47 : vector<1x128xf32>
    %cst_20 = arith.constant 0.000000e+00 : f32
    %49 = vector.broadcast %cst_20 : f32 to vector<1x128xf32>
    %50 = arith.maximumf %48, %49 : vector<1x128xf32>
    %51 = vector.extract_strided_slice %1 {offsets = [2, 0], sizes = [1, 128], strides = [1, 1]} : vector<4x128xf32> to vector<1x128xf32>
    %52 = vector.shape_cast %51 : vector<1x128xf32> to vector<128xf32>
    %cst_21 = arith.constant 9.99999974E-6 : f32
    %53 = vector.broadcast %cst_21 : f32 to vector<1x128xf32>
    %54 = arith.addf %50, %53 : vector<1x128xf32>
    %55 = math.rsqrt %54 : vector<1x128xf32>
    %56 = vector.shape_cast %52 : vector<128xf32> to vector<1x128xf32>
    %57 = arith.mulf %56, %55 : vector<1x128xf32>
    %58 = vector.extract_strided_slice %1 {offsets = [3, 0], sizes = [1, 128], strides = [1, 1]} : vector<4x128xf32> to vector<1x128xf32>
    %59 = vector.shape_cast %58 : vector<1x128xf32> to vector<128xf32>
    %60 = arith.mulf %44, %57 : vector<1x128xf32>
    %61 = vector.shape_cast %59 : vector<128xf32> to vector<1x128xf32>
    %62 = arith.subf %61, %60 : vector<1x128xf32>
    %63 = vector.broadcast %57 : vector<1x128xf32> to vector<8x128xf32>
    %64 = arith.mulf %37, %63 : vector<8x128xf32>
    %65 = vector.broadcast %62 : vector<1x128xf32> to vector<8x128xf32>
    %66 = arith.addf %64, %65 : vector<8x128xf32>
    %cst_22 = arith.constant 0.000000e+00 : f32
    %67 = vector.broadcast %cst_22 : f32 to vector<8x128xf32>
    %68 = arith.maximumf %66, %67 : vector<8x128xf32>
    %c0_23 = arith.constant 0 : index
    %c0_24 = arith.constant 0 : index
    %69 = vector.load %arg4[%c0_23, %c0_24] : memref<128x16xf32, #tpu.memory_space<vmem>>, vector<128x16xf32>
    %cst_25 = arith.constant dense<0.000000e+00> : vector<8x16xf32>
    %70 = tpu.matmul %68, %69, %cst_25 {dimension_numbers = #tpu.dot_dimension_numbers<[1], [0], [0], [1], [0, 0, 1, 1], [], []>} : vector<8x128xf32>, vector<128x16xf32>, vector<8x16xf32> -> vector<8x16xf32>
    %c0_26 = arith.constant 0 : index
    %c0_27 = arith.constant 0 : index
    %71 = vector.load %arg5[%c0_26, %c0_27] : memref<1x16xf32, #tpu.memory_space<vmem>>, vector<1x16xf32>
    %72 = vector.broadcast %71 : vector<1x16xf32> to vector<8x16xf32>
    %73 = arith.addf %70, %72 : vector<8x16xf32>
    %c0_28 = arith.constant 0 : index
    %c0_29 = arith.constant 0 : index
    %74 = vector.load %arg6[%c0_28, %c0_29] : memref<8x16xf32, #tpu.memory_space<vmem>>, vector<8x16xf32>
    tpu.vector_store %arg6[%c0_28, %c0_29], %73 {strides = array<i32>} : memref<8x16xf32, #tpu.memory_space<vmem>>, vector<8x16xf32>,
    return
  }
}

</mosaic_0001>

<bundles_post_ra>
// kernel: dnn_forward.1
= control target key start
LH: loop header
LB: loop body
LE: loop exit
PB: predicated region body
PF: predicated region fallthrough
CT: control target
= control target key end

     0   :  { %11 = vsyncpa [#allocation3], 0  ;;  %s770_s0 = inlined_call_operand.vmem [shape: f32[8,32], index: 0, kind: input, shape index: {}]   ;;  %s771_s1 = inlined_call_operand.hbm [shape: f32[32,128], index: 1, kind: input, shape index: {}]   ;;  %s772_s2 = inlined_call_operand.vmem [shape: f32[1,128,128], index: 2, kind: input, shape index: {}]   ;;  %s773_s3 = inlined_call_operand.vmem [shape: f32[4,128], index: 3, kind: input, shape index: {}]   ;;  %s774_s4 = inlined_call_operand.vmem [shape: f32[128,16], index: 4, kind: input, shape index: {}]   ;;  %s775_s5 = inlined_call_operand.vmem [shape: f32[1,16], index: 5, kind: input, shape index: {}]   ;;  %s776_s6 = inlined_call_operand.hbm [shape: f32[8,16], index: 6, kind: output, shape index: {}]  }
   0x1   :  { %12 = vsyncpa [#allocation4], 0  ;;  %s564_s21 = smov [#allocation2]  }
   0x2   :  { %s20_s22 = sshll.u32 %s564_s21, 4  ;;  %s21_s22 = int_to_ptr.vmem [resolvable:$true] %s20_s22 }
   0x3   :  { %s528_s23 = scalar_lea.vmem %s21_s22, 512  ;;  %p533_p1 = scmp.lt.s32.totalorder %s21_s22, %s21_s22 }
   0x4   :  { %p529_p0 = scmp.ne.s32.totalorder %s21_s22, %s528_s23  ;;  %p534_p2 = scmp.lt.s32.totalorder %s528_s23, %s528_s23 }
   0x6   :  { %p535_p3 = por %p534_p2, %p533_p1 }
   0x8   :  { %p536_p4 = pnand %p535_p3, %p529_p0 }
   0xa   :  { %539 = shalt.err (!%p536_p4)
}
   0xb   :  { %s565_s24 = smov 128   ;;  %s566_s25 = smov 8  }
   0xc   :  { %26 = dma.hbm_to_vmem [thread:$0]  %s771_s1, 512, %s21_s22, [#allocation3], %s565_s24, %s565_s24, %s566_s25  }
   0xd   :  { %560 = dma.done.wait [#allocation3], 512  }
   0xe   :  { %561 = vsyncadd [#allocation3], 4294966784  ;;  %v567_v0 = vmov 0.0   ;;  %vm568_vm0 = vmmov 0   ;;  %v43_v1 = vld [vmem:[#allocation2 + $0x18] sm:$0xff]  ;;  %v42_v2 = vld [vmem:[#allocation2 + $0x10] sm:$0xff]  ;;  %v144_v43 = vlaneseq }
   0xf   :  { %429 = vmatprep.subr.mxu0 %v567_v0  ;;  %437 = vmatprep.mubr.msk.f32.mxu0 %vm568_vm0, %v567_v0  ;;  %v41_v3 = vld [vmem:[#allocation2 + $0x8] sm:$0xff]  ;;  %v40_v4 = vld [vmem:[#allocation2] sm:$0xff]  ;;  %vm44_vm1 = vcmask 261120   ;;  %v170_v6 = vld [vmem:[%s772_s2 + $0x78] sm:$0xff]  ;;  %s569_s15 = smov [#allocation5]   ;;  %vm371_vm2 = vcmask 130048  }
  0x10   :  { %440 = vmatprep.subr.mxu1 %v567_v0  ;;  %472 = vmatprep.mubr.msk.f32.mxu1 %vm568_vm0, %v567_v0  ;;  %v38_v5 = vld [vmem:[%s770_s0] sm:$0xff]  ;;  %v169_v7 = vld [vmem:[%s772_s2 + $0x70] sm:$0xff]  ;;  %v168_v8 = vld [vmem:[%s772_s2 + $0x68] sm:$0xff]  ;;  %v686_v44 = vshrl.u32 %v144_v43, 7  ;;  %s379_s16 = sshll.u32 %s569_s15, 4  ;;  %s380_s16 = int_to_ptr.vmem [resolvable:$true] %s379_s16 }
  0x11   :  { %430 = vmatpush3.msra.mxu0 %v43_v1  ;;  %441 = vmatpush3.msra.mxu1 %v170_v6  ;;  %v167_v9 = vld [vmem:[%s772_s2 + $0x60] sm:$0xff]  ;;  %v166_v10 = vld [vmem:[%s772_s2 + $0x58] sm:$0xff]  ;;  %v165_v11 = vld [vmem:[%s772_s2 + $0x50] sm:$0xff]  ;;  %s540_s17 = scalar_lea.vmem %s380_s16, 128  ;;  %p545_p6 = scmp.lt.s32.totalorder %s380_s16, %s380_s16 }
  0x12   :  { %431 = vmatprep.subr.mxu0 %v567_v0  ;;  %442 = vmatprep.subr.mxu1 %v567_v0  ;;  %v164_v12 = vld [vmem:[%s772_s2 + $0x48] sm:$0xff]  ;;  %v163_v13 = vld [vmem:[%s772_s2 + $0x40] sm:$0xff]  ;;  %v162_v14 = vld [vmem:[%s772_s2 + $0x38] sm:$0xff]  ;;  %v146_v48 = vsub.s32 0, %v686_v44  ;;  %v151_v52 = vsub.s32 1, %v686_v44  ;;  %p541_p5 = scmp.ne.s32.totalorder %s380_s16, %s540_s17  ;;  %p546_p7 = scmp.lt.s32.totalorder %s540_s17, %s540_s17 }
  0x13   :  { %432 = vmatpush3.msra.mxu0 %v42_v2  ;;  %443 = vmatpush3.msra.mxu1 %v169_v7  ;;  %v161_v15 = vld [vmem:[%s772_s2 + $0x30] sm:$0xff]  ;;  %v160_v16 = vld [vmem:[%s772_s2 + $0x28] sm:$0xff]  ;;  %v159_v17 = vld [vmem:[%s772_s2 + $0x20] sm:$0xff] }
  0x14   :  { %433 = vmatprep.subr.mxu0 %v567_v0  ;;  %444 = vmatprep.subr.mxu1 %v567_v0  ;;  %v158_v18 = vld [vmem:[%s772_s2 + $0x18] sm:$0xff]  ;;  %v157_v19 = vld [vmem:[%s772_s2 + $0x10] sm:$0xff]  ;;  %v156_v20 = vld [vmem:[%s772_s2 + $0x8] sm:$0xff]  ;;  %p547_p8 = por %p546_p7, %p545_p6 }
  0x15   :  { %434 = vmatpush3.msra.mxu0 %v41_v3  ;;  %445 = vmatpush3.msra.mxu1 %v168_v8  ;;  %v155_v21 = vld [vmem:[%s772_s2] sm:$0xff]  ;;  %v293_v58 = vld [vmem:[%s774_s4 + $0x78] sm:$0xff]  ;;  %v292_v59 = vld [vmem:[%s774_s4 + $0x70] sm:$0xff] }
  0x16   :  { %435 = vmatprep.subr.mxu0 %v567_v0  ;;  %446 = vmatprep.subr.mxu1 %v567_v0  ;;  %v691_v45 = vld [vmem:[%s773_s3] sm:$0xf]  ;;  %v291_v60 = vld [vmem:[%s774_s4 + $0x68] sm:$0xff]  ;;  %v289_v62 = vld [vmem:[%s774_s4 + $0x58] sm:$0xff]  ;;  %p548_p9 = pnand %p547_p8, %p541_p5 }
  0x17   :  { %436 = vmatpush3.msra.mxu0 %v40_v4  ;;  %447 = vmatpush3.msra.mxu1 %v167_v9  ;;  %v290_v61 = vld [vmem:[%s774_s4 + $0x60] sm:$0xff]  ;;  %v288_v63 = vld [vmem:[%s774_s4 + $0x50] sm:$0xff]  ;;  %v287_v1 = vld [vmem:[%s774_s4 + $0x48] sm:$0xff] }
  0x18   :  { %438 = vmatmul.mubr.msk.f32.vlgmr.msra.gmra.mxu0 %vm44_vm1, %v38_v5  ;;  %475 = vmatprep.subr.mxu0 %v567_v0  ;;  %v286_v2 = vld [vmem:[%s774_s4 + $0x40] sm:$0xff]  ;;  %v285_v3 = vld [vmem:[%s774_s4 + $0x38] sm:$0xff]  ;;  %v284_v4 = vld [vmem:[%s774_s4 + $0x30] sm:$0xff] }
  0x19   :  { %507 = vmatprep.mubr.msk.f32.mxu0 %vm568_vm0, %v567_v0  ;;  %448 = vmatprep.subr.mxu1 %v567_v0  ;;  %v283_v5 = vld [vmem:[%s774_s4 + $0x28] sm:$0xff]  ;;  %v282_v6 = vld [vmem:[%s774_s4 + $0x20] sm:$0xff]  ;;  %v281_v7 = vld [vmem:[%s774_s4 + $0x18] sm:$0xff] }
  0x1a   :  { %449 = vmatpush3.msra.mxu1 %v166_v10  ;;  %476 = vmatpush3.msra.mxu0 %v293_v58  ;;  %v280_v8 = vld [vmem:[%s774_s4 + $0x10] sm:$0xff]  ;;  %v279_v9 = vld [vmem:[%s774_s4 + $0x8] sm:$0xff]  ;;  %v278_v10 = vld [vmem:[%s774_s4] sm:$0xff] }
  0x1b   :  { %450 = vmatprep.subr.mxu1 %v567_v0  ;;  %477 = vmatprep.subr.mxu0 %v567_v0  ;;  %v389_v43 = vld [vmem:[%s775_s5] ss:$0 sm:$0xff] }
  0x1c   :  { %451 = vmatpush3.msra.mxu1 %v165_v11  ;;  %478 = vmatpush3.msra.mxu0 %v292_v59 }
  0x1d   :  { %452 = vmatprep.subr.mxu1 %v567_v0  ;;  %479 = vmatprep.subr.mxu0 %v567_v0 }
  0x1e   :  { %453 = vmatpush3.msra.mxu1 %v164_v12  ;;  %480 = vmatpush3.msra.mxu0 %v291_v60 }
  0x1f   :  { %454 = vmatprep.subr.mxu1 %v567_v0  ;;  %481 = vmatprep.subr.mxu0 %v567_v0 }
  0x20   :  { %455 = vmatpush3.msra.mxu1 %v163_v13  ;;  %482 = vmatpush3.msra.mxu0 %v290_v61 }
  0x21   :  { %456 = vmatprep.subr.mxu1 %v567_v0  ;;  %483 = vmatprep.subr.mxu0 %v567_v0 }
  0x22   :  { %457 = vmatpush3.msra.mxu1 %v162_v14  ;;  %484 = vmatpush3.msra.mxu0 %v289_v62 }
  0x23   :  { %458 = vmatprep.subr.mxu1 %v567_v0  ;;  %485 = vmatprep.subr.mxu0 %v567_v0 }
  0x24   :  { %459 = vmatpush3.msra.mxu1 %v161_v15  ;;  %486 = vmatpush3.msra.mxu0 %v288_v63 }
  0x25   :  { %460 = vmatprep.subr.mxu1 %v567_v0  ;;  %487 = vmatprep.subr.mxu0 %v567_v0 }
  0x26   :  { %461 = vmatpush3.msra.mxu1 %v160_v16  ;;  %488 = vmatpush3.msra.mxu0 %v287_v1 }
  0x27   :  { %462 = vmatprep.subr.mxu1 %v567_v0  ;;  %489 = vmatprep.subr.mxu0 %v567_v0 }
  0x28   :  { %463 = vmatpush3.msra.mxu1 %v159_v17  ;;  %490 = vmatpush3.msra.mxu0 %v286_v2 }
  0x29   :  { %464 = vmatprep.subr.mxu1 %v567_v0  ;;  %491 = vmatprep.subr.mxu0 %v567_v0 }
  0x2a   :  { %465 = vmatpush3.msra.mxu1 %v158_v18  ;;  %492 = vmatpush3.msra.mxu0 %v285_v3 }
  0x2b   :  { %466 = vmatprep.subr.mxu1 %v567_v0  ;;  %493 = vmatprep.subr.mxu0 %v567_v0 }
  0x2c   :  { %467 = vmatpush3.msra.mxu1 %v157_v19  ;;  %494 = vmatpush3.msra.mxu0 %v284_v4 }
  0x2d   :  { %468 = vmatprep.subr.mxu1 %v567_v0  ;;  %495 = vmatprep.subr.mxu0 %v567_v0 }
  0x2e   :  { %469 = vmatpush3.msra.mxu1 %v156_v20  ;;  %496 = vmatpush3.msra.mxu0 %v283_v5 }
  0x2f   :  { %470 = vmatprep.subr.mxu1 %v567_v0  ;;  %497 = vmatprep.subr.mxu0 %v567_v0 }
  0x30   :  { %471 = vmatpush3.msra.mxu1 %v155_v21  ;;  %498 = vmatpush3.msra.mxu0 %v282_v6 }
  0x31   :  { %499 = vmatprep.subr.mxu0 %v567_v0 }
  0x32   :  { %500 = vmatpush3.msra.mxu0 %v281_v7 }
  0x33   :  { %501 = vmatprep.subr.mxu0 %v567_v0 }
  0x34   :  { %502 = vmatpush3.msra.mxu0 %v280_v8 }
  0x35   :  { %503 = vmatprep.subr.mxu0 %v567_v0 }
  0x36   :  { %504 = vmatpush3.msra.mxu0 %v279_v9 }
  0x37   :  { %505 = vmatprep.subr.mxu0 %v567_v0 }
  0x38   :  { %506 = vmatpush3.msra.mxu0 %v278_v10 }
  0xd8   :  { %v114_v22 = vpop.f32.mrf.mxu0 }
  0xd9   :  { %v118_v23 = vrot.slane %v114_v22, 4  ;;  %v124_v24 = vmul.f32 %v114_v22, %v114_v22 }
  0xda   :  { %v439_v25 = vpop.f32.mrf.mxu0 }
  0xdb   :  { %v119_v26 = vadd.f32 %v118_v23, %v114_v22  ;;  %v125_v27 = vrot.slane %v124_v24, 4 }
  0xdd   :  { %v120_v28 = vrot.slane %v119_v26, 2  ;;  %v126_v29 = vadd.f32 %v125_v27, %v124_v24 }
  0xdf   :  { %v121_v30 = vadd.f32 %v120_v28, %v119_v26  ;;  %v127_v31 = vrot.slane %v126_v29, 2 }
  0xe1   :  { %v122_v32 = vrot.slane %v121_v30, 1  ;;  %v128_v33 = vadd.f32 %v127_v31, %v126_v29 }
  0xe3   :  { %v123_v34 = vadd.f32 %v122_v32, %v121_v30  ;;  %v129_v35 = vrot.slane %v128_v33, 1 }
  0xe5   :  { %v130_v36 = vadd.f32 %v129_v35, %v128_v33  ;;  %v131_v37 = vmul.f32 0.125, %v123_v34  ;;  %v269_v33 = vsub.s32 2, %v686_v44 }
  0xe7   :  { %v132_v38 = vmul.f32 0.125, %v130_v36  ;;  %v133_v39 = vmul.f32 %v131_v37, %v131_v37 }
  0xe9   :  { %v134_v40 = vsub.f32 %v132_v38, %v133_v39 }
  0xeb   :  { %v135_v41 = vmax.f32 %v134_v40, 0.0 }
  0xed   :  { %v136_v42 = vadd.f32 1e-05, %v135_v41 }
  0xef   :  { %516 = vrsqrt.f32 %v136_v42 }
  0xfc   :  { %v517_v46 = vpop.eup %516 }
  0xfd   :  { %v138_v47 = vmul.f32 %v517_v46, %v691_v45 }
  0xff   :  { %v139_v49 = vmul.f32 %v138_v47, %v131_v37  ;;  %v147_v50 = vrot.slane %v138_v47, %v146_v48  ;;  %v274_v37 = vsub.s32 3, %v686_v44 }
 0x101   :  { %v141_v51 = vrot.slane %v139_v49, 7  ;;  %v148_v54 = vmul.f32 %v147_v50, %v114_v22 }
 0x103   :  { %v143_v53 = vsub.f32 %v691_v45, %v141_v51 }
 0x105   :  { %v152_v55 = vrot.slane %v143_v53, %v151_v52 }
 0x107   :  { %v153_v56 = vadd.f32 %v152_v55, %v148_v54 }
 0x109   :  { %v154_v57 = vmax.f32 %v153_v56, 0.0 }
 0x10b   :  { %473 = vmatmul.mubr.f32.vlgmr.msra.gmra.mxu1 %v154_v57 }
 0x1cb   :  { %v237_v11 = vpop.f32.mrf.mxu1 }
 0x1cc   :  { %v241_v12 = vrot.slane %v237_v11, 4  ;;  %v247_v13 = vmul.f32 %v237_v11, %v237_v11 }
 0x1cd   :  { %v474_v14 = vpop.f32.mrf.mxu1 }
 0x1ce   :  { %v242_v15 = vadd.f32 %v241_v12, %v237_v11  ;;  %v248_v16 = vrot.slane %v247_v13, 4 }
 0x1d0   :  { %v243_v17 = vrot.slane %v242_v15, 2  ;;  %v249_v18 = vadd.f32 %v248_v16, %v247_v13 }
 0x1d2   :  { %v244_v19 = vadd.f32 %v243_v17, %v242_v15  ;;  %v250_v20 = vrot.slane %v249_v18, 2 }
 0x1d4   :  { %v245_v21 = vrot.slane %v244_v19, 1  ;;  %v251_v22 = vadd.f32 %v250_v20, %v249_v18 }
 0x1d6   :  { %v246_v23 = vadd.f32 %v245_v21, %v244_v19  ;;  %v252_v24 = vrot.slane %v251_v22, 1 }
 0x1d8   :  { %v253_v25 = vadd.f32 %v252_v24, %v251_v22  ;;  %v254_v26 = vmul.f32 0.125, %v246_v23 }
 0x1da   :  { %v255_v27 = vmul.f32 0.125, %v253_v25  ;;  %v256_v28 = vmul.f32 %v254_v26, %v254_v26 }
 0x1dc   :  { %v257_v0 = vsub.f32 %v255_v27, %v256_v28 }
 0x1de   :  { %v258_v29 = vmax.f32 %v257_v0, 0.0 }
 0x1e0   :  { %v259_v30 = vadd.f32 1e-05, %v258_v29 }
 0x1e2   :  { %518 = vrsqrt.f32 %v259_v30 }
 0x1ef   :  { %v519_v31 = vpop.eup %518 }
 0x1f0   :  { %v261_v32 = vmul.f32 %v519_v31, %v691_v45 }
 0x1f2   :  { %v262_v34 = vmul.f32 %v261_v32, %v254_v26  ;;  %v270_v36 = vrot.slane %v261_v32, %v269_v33 }
 0x1f4   :  { %v264_v35 = vrot.slane %v262_v34, 7  ;;  %v271_v39 = vmul.f32 %v270_v36, %v237_v11 }
 0x1f6   :  { %v266_v38 = vsub.f32 %v691_v45, %v264_v35 }
 0x1f8   :  { %v275_v40 = vrot.slane %v266_v38, %v274_v37 }
 0x1fa   :  { %v276_v41 = vadd.f32 %v275_v40, %v271_v39 }
 0x1fc   :  { %v277_v42 = vmax.f32 %v276_v41, 0.0 }
 0x1fe   :  { %508 = vmatmul.mubr.f32.vlgmr.msra.gmra.mxu0 %v277_v42 }
 0x2be   :  { %v367_v46 = vpop.f32.mrf.mxu0 }
 0x2bf   :  { %v368_v47 = vadd.f32 %v389_v43, %v367_v46 }
 0x2c0   :  { %v509_v48 = vpop.f32.mrf.mxu0 }
 0x2c1   :  { %372 = vst.msk [vmem:[#allocation5] sm:$0xff] %vm371_vm2, %v368_v47 }
 0x2c2   :  { %551 = shalt.err (!%p548_p9)
}
 0x2c3   :  { %382 = dma.vmem_to_hbm [thread:$0]  %s380_s16, 128, %s776_s6, [#allocation4]  }
 0x2c4   :  { %562 = dma.done.wait [#allocation4], 128  }
 0x2c5   :  { %563 = vsyncadd [#allocation4], 4294967168 }
 0x2c6   :  { %386 = vsyncpa [#allocation3], 1 }
 0x2c7   :  { %387 = vsyncpa [#allocation4], 1 }

</bundles_post_ra>
